<compile_context>
chip_gen: v7x
topology: tpu7x:2x2x1
jax: 0.10.0
libtpu: 0.0.40
codegen_flags: <defaults>
</compile_context>

<pallas_src>
import functools
import math

import jax
import jax.numpy as jnp
from jax.experimental import pallas as pl
from jax.experimental.pallas import tpu as pltpu


def _round_up(n, m):
    return ((n + m - 1) // m) * m


def qnetwork_kernel(x_ref, w1_ref, w2_ref, w3_ref, out_ref, *, ones_lanes):
    """3 MXU matmuls + VPU ReLU per batch block. Biases are folded into the
    weight matrices via a constant 1.0 lane injected into each activation."""
    l0, l1, l2 = ones_lanes  # static Python ints

    def put_one(v, lane):
        # The `lane` column of v is zero (padding); set it to 1.0 so the next
        # matmul picks up the bias row that was folded into the weights.
        idx = jax.lax.broadcasted_iota(jnp.int32, v.shape, dimension=1)
        return jnp.where(idx == lane, jnp.float32(1.0), v)

    wdt = w1_ref.dtype  # compute dtype of the MXU operands (f32 or bf16)

    x = put_one(x_ref[...].astype(jnp.float32), l0)
    h1 = jnp.dot(x.astype(wdt), w1_ref[...], preferred_element_type=jnp.float32)
    h1 = put_one(jnp.maximum(h1, 0.0), l1)           # ReLU in f32

    h2 = jnp.dot(h1.astype(wdt), w2_ref[...], preferred_element_type=jnp.float32)
    h2 = put_one(jnp.maximum(h2, 0.0), l2)           # ReLU in f32

    out = jnp.dot(h2.astype(wdt), w3_ref[...], preferred_element_type=jnp.float32)
    out_ref[...] = out.astype(out_ref.dtype)


def init_qnetwork_params(key, obs_dim, n_actions, h1=120, h2=84):
    """Deterministic init mimicking torch.nn.Linear defaults
    (U[-1/sqrt(fan_in), 1/sqrt(fan_in)]). Weights stored as (in, out)."""
    dims = [(obs_dim, h1), (h1, h2), (h2, n_actions)]
    params = []
    for (fan_in, fan_out) in dims:
        key, kw, kb = jax.random.split(key, 3)
        bound = 1.0 / math.sqrt(fan_in)
        w = jax.random.uniform(kw, (fan_in, fan_out), jnp.float32, -bound, bound)
        b = jax.random.uniform(kb, (fan_out,), jnp.float32, -bound, bound)
        params.append((w, b))
    return params


def prepare_qnetwork_params(params, dtype=jnp.bfloat16):
    """One-time host-side packing: pad K dims to multiples of 8 (not 128), fold
    each bias in as an extra weight row, and cast to the storage dtype."""
    (w1, b1), (w2, b2), (w3, b3) = params
    obs_dim, h1 = w1.shape
    h2 = w2.shape[1]
    n_actions = w3.shape[1]

    Dp = _round_up(obs_dim + 1, 8)   # lanes of x  / rows of w1  (K of matmul 1)
    H1p = _round_up(h1 + 1, 8)       # lanes of h1 / rows of w2  (K of matmul 2)
    H2p = _round_up(h2 + 1, 8)       # lanes of h2 / rows of w3  (K of matmul 3)
    Ap = n_actions                   # tiny masked store beats padding w3 to 128

    def aug(w, b, rows, cols, bias_row):
        m = jnp.zeros((rows, cols), jnp.float32)
        m = m.at[: w.shape[0], : w.shape[1]].set(w)
        m = m.at[bias_row, : w.shape[1]].set(b)   # bias folded in as a weight row
        return m.astype(dtype)

    w1a = aug(w1, b1, Dp, H1p, obs_dim)
    w2a = aug(w2, b2, H1p, H2p, h1)
    w3a = aug(w3, b3, H2p, Ap, h2)
    ones_lanes = (obs_dim, h1, h2)   # where to inject the constant 1.0 per layer
    return (w1a, w2a, w3a, ones_lanes)


def qnetwork_forward(x, prepared, *, batch_block=256):
    """x: (batch, obs_dim) float32. Returns (batch, n_actions) float32.

    For batch <= batch_block: single grid point, everything in VMEM.
    For larger (training) batches: 1-D grid over batch blocks; weights stay
    resident in VMEM (constant index_map) and the axis is marked "parallel"
    so both v7x TensorCores are used. Use batch_block=128 on v5e.
    """
    w1a, w2a, w3a, ones_lanes = prepared
    B, obs_dim = x.shape
    Dp, H1p = w1a.shape
    H2p, Ap = w3a.shape

    bb = _round_up(B, 8) if B <= batch_block else _round_up(batch_block, 8)
    Bp = _round_up(B, bb)
    # Only x is padded per call (zero pad is exact; extra rows are sliced off).
    x_p = jnp.pad(x, ((0, Bp - B), (0, Dp - obs_dim)))

    kernel = functools.partial(qnetwork_kernel, ones_lanes=ones_lanes)
    out = pl.pallas_call(
        kernel,
        out_shape=jax.ShapeDtypeStruct((Bp, Ap), jnp.float32),
        grid_spec=pltpu.PrefetchScalarGridSpec(
            num_scalar_prefetch=0,
            grid=(Bp // bb,),
            in_specs=[
                pl.BlockSpec((bb, Dp), lambda i: (i, 0)),
                pl.BlockSpec((Dp, H1p), lambda i: (0, 0)),   # weights resident
                pl.BlockSpec((H1p, H2p), lambda i: (0, 0)),  # across grid steps
                pl.BlockSpec((H2p, Ap), lambda i: (0, 0)),
            ],
            out_specs=pl.BlockSpec((bb, Ap), lambda i: (i, 0)),
        ),
        compiler_params=pltpu.CompilerParams(
            dimension_semantics=("parallel",),
        ),
    )(x_p, w1a, w2a, w3a)
    return out[:B]


def qnetwork_reference(x, params):
    """Plain-JAX reference for verification."""
    (w1, b1), (w2, b2), (w3, b3) = params
    h = jnp.maximum(x @ w1 + b1, 0.0)
    h = jnp.maximum(h @ w2 + b2, 0.0)
    return h @ w3 + b3


if __name__ == "__main__":
    key = jax.random.PRNGKey(0)
    k_params, k_x, k_xbig = jax.random.split(key, 3)

    batch = 8       # small inference batch of observations
    obs_dim = 16    # prod(env.single_observation_space.shape)
    n_actions = 4   # env.single_action_space.n

    params = init_qnetwork_params(k_params, obs_dim, n_actions)
    x = jax.random.normal(k_x, (batch, obs_dim), jnp.float32)
    ref = qnetwork_reference(x, params)

    # --- float32 weights (exact path, v5e-friendly) ---
    prep_f32 = prepare_qnetwork_params(params, dtype=jnp.float32)
    out_f32 = jax.block_until_ready(qnetwork_forward(x, prep_f32))
    assert out_f32.shape == (batch, n_actions)
    assert jnp.allclose(out_f32, ref, atol=1e-4, rtol=1e-4), "f32 mismatch vs reference"

    # --- bfloat16 weights (v6e/v7x fast path); compare vs a reference built from
    #     the same bf16-rounded weights so the check stays tight ---
    prep_bf16 = prepare_qnetwork_params(params, dtype=jnp.bfloat16)
    params_q = [(w.astype(jnp.bfloat16).astype(jnp.float32),
                 b.astype(jnp.bfloat16).astype(jnp.float32)) for (w, b) in params]
    ref_q = qnetwork_reference(x, params_q)
    out_bf16 = jax.block_until_ready(qnetwork_forward(x, prep_bf16))
    assert jnp.allclose(out_bf16, ref_q, atol=1e-2, rtol=1e-2), "bf16 mismatch vs reference"

    # --- training-size batch exercising the batch grid (2 parallel steps of 256) ---
    xb = jax.random.normal(k_xbig, (512, obs_dim), jnp.float32)
    out_big = jax.block_until_ready(qnetwork_forward(xb, prep_bf16, batch_block=256))
    ref_big = qnetwork_reference(xb, params_q)
    assert out_big.shape == (512, n_actions)
    assert jnp.allclose(out_big, ref_big, atol=1e-2, rtol=1e-2), "batched bf16 mismatch"

    print("KERNEL_OK")
</pallas_src>

<mosaic_0001>
module attributes {stable_mosaic.version = 11 : i64} {
  func.func @qnetwork_kernel(%arg0: i32, %arg1: memref<8x24xf32, #tpu.memory_space<vmem>>, %arg2: memref<24x128xf32, #tpu.memory_space<vmem>>, %arg3: memref<128x88xf32, #tpu.memory_space<vmem>>, %arg4: memref<88x4xf32, #tpu.memory_space<vmem>>, %arg5: memref<8x4xf32, #tpu.memory_space<vmem>>) attributes {dimension_semantics = [#tpu.dimension_semantics<parallel>], iteration_bounds = array<i64: 1>, scalar_prefetch = 0 : i64, scratch_operands = 0 : i64, tpu.core_type = #tpu.core_type<tc>, window_params = [{transform_indices = @transform_0, window_bounds = array<i64: 8, 24>}, {pipeline_mode = #tpu.pipeline_mode<synchronous>, transform_indices = @transform_1, window_bounds = array<i64: 24, 128>}, {pipeline_mode = #tpu.pipeline_mode<synchronous>, transform_indices = @transform_2, window_bounds = array<i64: 128, 88>}, {pipeline_mode = #tpu.pipeline_mode<synchronous>, transform_indices = @transform_3, window_bounds = array<i64: 88, 4>}, {transform_indices = @transform_4, window_bounds = array<i64: 8, 4>}]} {
    %c0 = arith.constant 0 : index
    %c0_0 = arith.constant 0 : index
    %0 = vector.load %arg1[%c0, %c0_0] : memref<8x24xf32, #tpu.memory_space<vmem>>, vector<8x24xf32>
    %1 = tpu.iota {dimensions = array<i32: 1>} : vector<8x24xi32>
    %c16_i32 = arith.constant 16 : i32
    %2 = vector.broadcast %c16_i32 : i32 to vector<8x24xi32>
    %3 = arith.cmpi eq, %1, %2 : vector<8x24xi32>
    %cst = arith.constant 1.000000e+00 : f32
    %4 = vector.broadcast %cst : f32 to vector<8x24xf32>
    %5 = arith.select %3, %4, %0 : vector<8x24xi1>, vector<8x24xf32>
    %c0_1 = arith.constant 0 : index
    %c0_2 = arith.constant 0 : index
    %6 = vector.load %arg2[%c0_1, %c0_2] : memref<24x128xf32, #tpu.memory_space<vmem>>, vector<24x128xf32>
    %cst_3 = arith.constant dense<0.000000e+00> : vector<8x128xf32>
    %7 = tpu.matmul %5, %6, %cst_3 {dimension_numbers = #tpu.dot_dimension_numbers<[1], [0], [0], [1], [0, 0, 1, 1], [], []>} : vector<8x24xf32>, vector<24x128xf32>, vector<8x128xf32> -> vector<8x128xf32>
    %cst_4 = arith.constant 0.000000e+00 : f32
    %8 = vector.broadcast %cst_4 : f32 to vector<8x128xf32>
    %9 = arith.maximumf %7, %8 : vector<8x128xf32>
    %10 = tpu.iota {dimensions = array<i32: 1>} : vector<8x128xi32>
    %c120_i32 = arith.constant 120 : i32
    %11 = vector.broadcast %c120_i32 : i32 to vector<8x128xi32>
    %12 = arith.cmpi eq, %10, %11 : vector<8x128xi32>
    %cst_5 = arith.constant 1.000000e+00 : f32
    %13 = vector.broadcast %cst_5 : f32 to vector<8x128xf32>
    %14 = arith.select %12, %13, %9 : vector<8x128xi1>, vector<8x128xf32>
    %c0_6 = arith.constant 0 : index
    %c0_7 = arith.constant 0 : index
    %15 = vector.load %arg3[%c0_6, %c0_7] : memref<128x88xf32, #tpu.memory_space<vmem>>, vector<128x88xf32>
    %cst_8 = arith.constant dense<0.000000e+00> : vector<8x88xf32>
    %16 = tpu.matmul %14, %15, %cst_8 {dimension_numbers = #tpu.dot_dimension_numbers<[1], [0], [0], [1], [0, 0, 1, 1], [], []>} : vector<8x128xf32>, vector<128x88xf32>, vector<8x88xf32> -> vector<8x88xf32>
    %cst_9 = arith.constant 0.000000e+00 : f32
    %17 = vector.broadcast %cst_9 : f32 to vector<8x88xf32>
    %18 = arith.maximumf %16, %17 : vector<8x88xf32>
    %19 = tpu.iota {dimensions = array<i32: 1>} : vector<8x88xi32>
    %c84_i32 = arith.constant 84 : i32
    %20 = vector.broadcast %c84_i32 : i32 to vector<8x88xi32>
    %21 = arith.cmpi eq, %19, %20 : vector<8x88xi32>
    %cst_10 = arith.constant 1.000000e+00 : f32
    %22 = vector.broadcast %cst_10 : f32 to vector<8x88xf32>
    %23 = arith.select %21, %22, %18 : vector<8x88xi1>, vector<8x88xf32>
    %c0_11 = arith.constant 0 : index
    %c0_12 = arith.constant 0 : index
    %24 = vector.load %arg4[%c0_11, %c0_12] : memref<88x4xf32, #tpu.memory_space<vmem>>, vector<88x4xf32>
    %cst_13 = arith.constant dense<0.000000e+00> : vector<8x4xf32>
    %25 = tpu.matmul %23, %24, %cst_13 {dimension_numbers = #tpu.dot_dimension_numbers<[1], [0], [0], [1], [0, 0, 1, 1], [], []>} : vector<8x88xf32>, vector<88x4xf32>, vector<8x4xf32> -> vector<8x4xf32>
    %c0_14 = arith.constant 0 : index
    %c0_15 = arith.constant 0 : index
    %26 = vector.load %arg5[%c0_14, %c0_15] : memref<8x4xf32, #tpu.memory_space<vmem>>, vector<8x4xf32>
    tpu.vector_store %arg5[%c0_14, %c0_15], %25 {strides = array<i32>} : memref<8x4xf32, #tpu.memory_space<vmem>>, vector<8x4xf32>,
    return
  }
  func.func @transform_0(%arg0: i32) -> (i32, i32) {
    %c0_i32 = arith.constant 0 : i32
    %c0_i32_0 = arith.constant 0 : i32
    return %arg0, %c0_i32 : i32, i32
  }
  func.func @transform_1(%arg0: i32) -> (i32, i32) {
    %c0_i32 = arith.constant 0 : i32
    %c0_i32_0 = arith.constant 0 : i32
    %c0_i32_1 = arith.constant 0 : i32
    return %c0_i32, %c0_i32_0 : i32, i32
  }
  func.func @transform_2(%arg0: i32) -> (i32, i32) {
    %c0_i32 = arith.constant 0 : i32
    %c0_i32_0 = arith.constant 0 : i32
    %c0_i32_1 = arith.constant 0 : i32
    return %c0_i32, %c0_i32_0 : i32, i32
  }
  func.func @transform_3(%arg0: i32) -> (i32, i32) {
    %c0_i32 = arith.constant 0 : i32
    %c0_i32_0 = arith.constant 0 : i32
    %c0_i32_1 = arith.constant 0 : i32
    return %c0_i32, %c0_i32_0 : i32, i32
  }
  func.func @transform_4(%arg0: i32) -> (i32, i32) {
    %c0_i32 = arith.constant 0 : i32
    %c0_i32_0 = arith.constant 0 : i32
    return %arg0, %c0_i32 : i32, i32
  }
}

</mosaic_0001>

<bundles_post_ra>
// kernel: tpu_custom_call.1
= control target key start
LH: loop header
LB: loop body
LE: loop exit
PB: predicated region body
PF: predicated region fallthrough
CT: control target
= control target key end

     0   :  { %v18_v0 = vlaneseq  ;;  %v431_v1 = vmov 0.0|0.0   ;;  %vm432_vm0 = vmmov 0   ;;  %v433_v4 = vmov 0.0   ;;  %s582_s1 = inlined_call_operand.vmem [shape: f32[24,128], index: 1, kind: input, shape index: {}]   ;;  %s583_s0 = inlined_call_operand.vmem [shape: f32[8,24], index: 0, kind: input, shape index: {}]   ;;  %s584_s2 = inlined_call_operand.vmem [shape: f32[128,88], index: 2, kind: input, shape index: {}]   ;;  %s585_s3 = inlined_call_operand.vmem [shape: f32[88,4], index: 3, kind: input, shape index: {}]   ;;  %s586_s4 = inlined_call_operand.vmem [shape: f32[8,4], index: 4, kind: output, shape index: {}]  }
   0x1   :  { %386 = vmatprep.subr.bf16.mxu0 %v431_v1  ;;  %v22_v2 = vld [vmem:[%s582_s1] sm:$0xff]  ;;  %v23_v3 = vld [vmem:[%s582_s1 + $0x8] sm:$0xff]  ;;  %323 = vmatprep.mubr.msk.f32.mxu0 %vm432_vm0, %v433_v4  ;;  %v104_v11 = vld [vmem:[%s584_s2 + $0x10] sm:$0xff]  ;;  %vm25_vm2 = vcmask 195584   ;;  %vm202_vm5 = vcmask 719872   ;;  %vm276_vm6 = vcmask 31744  }
   0x2   :  { %v387_v5 = vpack.c.bf16 %v23_v3, %v22_v2  ;;  %v468_v6 = vand.u32 127, %v18_v0  ;;  %389 = vmatprep.subr.bf16.mxu1 %v431_v1  ;;  %v102_v7 = vld [vmem:[%s584_s2] sm:$0xff]  ;;  %v103_v8 = vld [vmem:[%s584_s2 + $0x8] sm:$0xff]  ;;  %358 = vmatprep.mubr.msk.f32.mxu1 %vm432_vm0, %v433_v4  ;;  %v105_v12 = vld [vmem:[%s584_s2 + $0x18] sm:$0xff] }
   0x3   :  { %v17_v9 = vld [vmem:[%s583_s0] sm:$0xff]  ;;  %v390_v10 = vpack.c.bf16 %v103_v8, %v102_v7  ;;  %v24_v13 = vld [vmem:[%s582_s1 + $0x10] sm:$0xff]  ;;  %v393_v14 = vpack.c.bf16 %v105_v12, %v104_v11  ;;  %v107_v17 = vld [vmem:[%s584_s2 + $0x28] sm:$0xff] }
   0x4   :  { %388 = vmatpush3.bf16.msra.mxu0 %v387_v5  ;;  %vm20_vm1 = vcmp.eq.s32.totalorder %v468_v6, 16  ;;  %v106_v16 = vld [vmem:[%s584_s2 + $0x20] sm:$0xff]  ;;  %v108_v19 = vld [vmem:[%s584_s2 + $0x30] sm:$0xff]  ;;  %v109_v20 = vld [vmem:[%s584_s2 + $0x38] sm:$0xff]  ;;  %vm100_vm3 = vcmp.eq.s32.totalorder %v468_v6, 120  ;;  %vm189_vm4 = vcmp.eq.s32.totalorder %v468_v6, 84 }
   0x5   :  { %321 = vmatprep.subr.mxu0 %v433_v4  ;;  %391 = vmatpush3.bf16.msra.mxu1 %v390_v10  ;;  %v21_v15 = vsel %vm20_vm1, 1.0, %v17_v9  ;;  %v396_v18 = vpack.c.bf16 %v107_v17, %v106_v16  ;;  %v399_v21 = vpack.c.bf16 %v109_v20, %v108_v19  ;;  %v110_v22 = vld [vmem:[%s584_s2 + $0x40] sm:$0xff]  ;;  %v111_v23 = vld [vmem:[%s584_s2 + $0x48] sm:$0xff]  ;;  %v112_v25 = vld [vmem:[%s584_s2 + $0x50] sm:$0xff] }
   0x6   :  { %392 = vmatprep.subr.bf16.mxu1 %v431_v1  ;;  %v402_v24 = vpack.c.bf16 %v111_v23, %v110_v22  ;;  %v113_v26 = vld [vmem:[%s584_s2 + $0x58] sm:$0xff]  ;;  %v114_v28 = vld [vmem:[%s584_s2 + $0x60] sm:$0xff]  ;;  %v115_v29 = vld [vmem:[%s584_s2 + $0x68] sm:$0xff] }
   0x7   :  { %v405_v27 = vpack.c.bf16 %v113_v26, %v112_v25  ;;  %v408_v30 = vpack.c.bf16 %v115_v29, %v114_v28  ;;  %v116_v31 = vld [vmem:[%s584_s2 + $0x70] sm:$0xff]  ;;  %v117_v32 = vld [vmem:[%s584_s2 + $0x78] sm:$0xff]  ;;  %v191_v34 = vld [vmem:[%s585_s3] sm:$0xff] }
   0x8   :  { %322 = vmatpush3.msra.mxu0 %v24_v13  ;;  %v411_v33 = vpack.c.bf16 %v117_v32, %v116_v31  ;;  %v192_v35 = vld [vmem:[%s585_s3 + $0x8] sm:$0xff]  ;;  %v193_v36 = vld [vmem:[%s585_s3 + $0x10] sm:$0xff]  ;;  %v194_v38 = vld [vmem:[%s585_s3 + $0x18] sm:$0xff] }
   0x9   :  { %324 = vmatmul.mubr.msk.f32.vlgmr.msra.gmra.mrb[0].mxu0 %vm25_vm2, %v21_v15  ;;  %394 = vmatpush3.bf16.msra.mxu1 %v393_v14  ;;  %v414_v37 = vpack.c.bf16 %v192_v35, %v191_v34  ;;  %v417_v39 = vpack.c.bf16 %v194_v38, %v193_v36  ;;  %v195_v40 = vld [vmem:[%s585_s3 + $0x20] sm:$0xff]  ;;  %v196_v41 = vld [vmem:[%s585_s3 + $0x28] sm:$0xff]  ;;  %v197_v43 = vld [vmem:[%s585_s3 + $0x30] sm:$0xff] }
   0xa   :  { %395 = vmatprep.subr.bf16.mxu1 %v431_v1  ;;  %413 = vmatprep.subr.bf16.mxu0 %v431_v1  ;;  %v420_v42 = vpack.c.bf16 %v196_v41, %v195_v40  ;;  %v198_v44 = vld [vmem:[%s585_s3 + $0x38] sm:$0xff]  ;;  %v199_v46 = vld [vmem:[%s585_s3 + $0x40] sm:$0xff]  ;;  %v200_v47 = vld [vmem:[%s585_s3 + $0x48] sm:$0xff] }
   0xb   :  { %383 = vmatprep.mubr.msk.f32.mxu0 %vm432_vm0, %v433_v4  ;;  %415 = vmatpush3.bf16.msra.mxu0 %v414_v37  ;;  %v423_v45 = vpack.c.bf16 %v198_v44, %v197_v43  ;;  %v426_v48 = vpack.c.bf16 %v200_v47, %v199_v46  ;;  %v201_v53 = vld [vmem:[%s585_s3 + $0x50] sm:$0xff] }
   0xc   :  { %416 = vmatprep.subr.bf16.mxu0 %v431_v1 }
   0xd   :  { %397 = vmatpush3.bf16.msra.mxu1 %v396_v18 }
   0xe   :  { %398 = vmatprep.subr.bf16.mxu1 %v431_v1 }
   0xf   :  { %418 = vmatpush3.bf16.msra.mxu0 %v417_v39 }
  0x10   :  { %419 = vmatprep.subr.bf16.mxu0 %v431_v1 }
  0x11   :  { %400 = vmatpush3.bf16.msra.mxu1 %v399_v21 }
  0x12   :  { %401 = vmatprep.subr.bf16.mxu1 %v431_v1 }
  0x13   :  { %421 = vmatpush3.bf16.msra.mxu0 %v420_v42 }
  0x14   :  { %422 = vmatprep.subr.bf16.mxu0 %v431_v1 }
  0x15   :  { %403 = vmatpush3.bf16.msra.mxu1 %v402_v24 }
  0x16   :  { %404 = vmatprep.subr.bf16.mxu1 %v431_v1 }
  0x17   :  { %424 = vmatpush3.bf16.msra.mxu0 %v423_v45 }
  0x18   :  { %425 = vmatprep.subr.bf16.mxu0 %v431_v1 }
  0x19   :  { %406 = vmatpush3.bf16.msra.mxu1 %v405_v27 }
  0x1a   :  { %407 = vmatprep.subr.bf16.mxu1 %v431_v1 }
  0x1b   :  { %427 = vmatpush3.bf16.msra.mxu0 %v426_v48 }
  0x1c   :  { %381 = vmatprep.subr.mxu0 %v433_v4 }
  0x1d   :  { %409 = vmatpush3.bf16.msra.mxu1 %v408_v30 }
  0x1e   :  { %410 = vmatprep.subr.bf16.mxu1 %v431_v1 }
  0x1f   :  { %382 = vmatpush3.msra.mxu0 %v201_v53 }
  0x21   :  { %412 = vmatpush3.bf16.msra.mxu1 %v411_v33 }
  0xdc   :  { %v95_v49 = vpop.f32.mrb[0].mxu0 }
  0xdd   :  { %v99_v50 = vmax.f32 %v95_v49, 0.0  ;;  %v325_v51 = vpop.f32.mrb[1].mxu0 }
  0xdf   :  { %v101_v52 = vsel %vm100_vm3, 1.0, %v99_v50 }
  0xe0   :  { %359 = vmatmul.mubr.f32.vlgmr.msra.gmra.mrb[0].mxu1 %v101_v52 }
 0x1b3   :  { %v184_v54 = vpop.f32.mrb[0].mxu1 }
 0x1b4   :  { %v188_v55 = vmax.f32 %v184_v54, 0.0  ;;  %v360_v56 = vpop.f32.mrb[1].mxu1 }
 0x1b6   :  { %v190_v57 = vsel %vm189_vm4, 1.0, %v188_v55 }
 0x1b7   :  { %384 = vmatmul.mubr.msk.f32.vlgmr.msra.gmra.mrb[2].mxu0 %vm202_vm5, %v190_v57 }
 0x28a   :  { %v272_v58 = vpop.f32.mrb[2].mxu0 }
 0x28b   :  { %277 = vst.msk [vmem:[%s586_s4] sm:$0xff] %vm276_vm6, %v272_v58  ;;  %v385_v59 = vpop.f32.mrb[3].mxu0 }

</bundles_post_ra>
